<compile_context>
chip_gen: v7x
topology: tpu7x:2x2x1
jax: 0.10.0
libtpu: 0.0.40
codegen_flags: <defaults>
</compile_context>

<pallas_src>
import jax
import jax.numpy as jnp
from jax.experimental import pallas as pl
from jax.experimental.pallas import tpu as pltpu


def _round_up(n, m):
    return (n + m - 1) // m * m


def _vmem_caps():
    """(tile budget, vmem_limit_bytes) — generation aware, conservative fallback."""
    try:
        info = pltpu.get_tpu_info()
        cap = int(getattr(info, "vmem_capacity_bytes", 0)) or 64 * 1024 * 1024
    except Exception:
        cap = 64 * 1024 * 1024          # v7x-sized fallback: safe on every gen
    budget = int(cap * 0.6)              # resident weight + pipelined tiles live here
    limit = int(cap * 0.75)              # scoped-VMEM limit handed to Mosaic
    return budget, limit


def _pick_tiles(M, K_pad, N, out_itemsize, budget):
    """Choose (TM, TN, weight_resident) from the per-generation VMEM budget."""
    w_bytes = K_pad * N * 2 + N * 4                     # bf16 weight + f32 bias, 1 copy
    weight_resident = w_bytes <= budget // 2
    if weight_resident:
        TN = N
        fixed = w_bytes                                  # untiled VMEM: single-buffered
    else:
        # Stream (K_pad, TN) weight slabs (double-buffered); TN multiple of 128.
        TN = 1024
        while TN > 128 and 2 * (K_pad * TN * 2 + TN * 4) > budget // 2:
            TN //= 2
        TN = min(TN, _round_up(N, 128))
        fixed = 2 * (K_pad * TN * 2 + TN * 4)

    per_row = 2 * K_pad * 2 + 2 * TN * out_itemsize      # dbuf patches + dbuf output
    tm = max(8, ((budget - fixed) // per_row) // 8 * 8)
    tm = min(tm, 4096)

    # Keep >=2 grid steps along M (>=4 when M is large) so v7x's two TensorCores
    # can split the parallel axis and DMA/compute overlap is possible.
    target_steps = 4 if M >= 4 * 512 else 2
    tm = min(tm, max(8, _round_up(pl.cdiv(M, target_steps), 8)))

    if M <= 8:
        tm = M
    else:
        tm = min(tm, (M // 8) * 8)
    return tm, TN, weight_resident


def _patch_proj_kernel(p_ref, w_ref, b_ref, o_ref):
    # p: (TM, K_pad) bf16 | w: (K_pad, TN) bf16 | b: (1, TN) f32 | o: (TM, TN)
    acc = jnp.dot(p_ref[...], w_ref[...], preferred_element_type=jnp.float32)
    o_ref[...] = (acc + b_ref[...]).astype(o_ref.dtype)


def prepare_projection(weight, bias):
    """Conv2d(kernel=stride=P) params -> ((K, N) bf16 GEMM weight, (1, N) f32 bias).

    Hoist/cache this outside the per-step path so the transpose+cast is not
    re-materialized on every call.
    """
    hidden = weight.shape[0]
    k = weight.shape[1] * weight.shape[2] * weight.shape[3]
    w_mat = weight.reshape(hidden, k).T.astype(jnp.bfloat16)       # (K, N)
    b_mat = bias.astype(jnp.float32).reshape(1, hidden)            # (1, N)
    return w_mat, b_mat


def patch_embeddings(x, weight, bias, patch_size, *, out_dtype=None,
                     prepared=None, force_pallas=False):
    """Forward pass of the PyTorch PatchEmbeddings module.

    x:      (B, C, H, W)       NCHW activations
    weight: (hidden, C, P, P)  nn.Conv2d weight
    bias:   (hidden,)          nn.Conv2d bias
    returns (B, num_patches, hidden) in `out_dtype` (default: x.dtype).
    """
    B, C, H, W = x.shape
    P = patch_size
    nh, nw = H // P, W // P
    num_patches = nh * nw
    N = weight.shape[0]
    K = C * P * P
    M = B * num_patches
    out_dtype = x.dtype if out_dtype is None else out_dtype

    if prepared is None:
        prepared = prepare_projection(weight, bias)
    w_mat, b_mat = prepared                                         # (K, N), (1, N)

    # Patchify glue: bf16 cast first (halves the transpose's HBM traffic), then
    # the zero-FLOP reorder; XLA fuses cast+transpose+pad into one producer pass.
    xb = x.astype(jnp.bfloat16)
    patches = xb.reshape(B, C, nh, P, nw, P).transpose(0, 2, 4, 1, 3, 5)
    patches = patches.reshape(M, K)

    # Launch-overhead guard: a toy GEMM is dominated by pallas_call dispatch.
    if not force_pallas and 2 * M * K * N < (1 << 22):
        out = (jnp.dot(patches, w_mat, preferred_element_type=jnp.float32)
               + b_mat).astype(out_dtype)
        return out.reshape(B, num_patches, N)

    # Lane-align K: zeros are numerically inert, give lane-dense patch loads
    # and a clean MXU K-cadence when C*P*P is not already 128-aligned.
    K_pad = _round_up(K, 128)
    if K_pad != K:
        patches = jnp.pad(patches, ((0, 0), (0, K_pad - K)))
        w_mat = jnp.pad(w_mat, ((0, K_pad - K), (0, 0)))

    budget, vmem_limit = _vmem_caps()
    out_itemsize = jnp.dtype(out_dtype).itemsize
    TM, TN, weight_resident = _pick_tiles(M, K_pad, N, out_itemsize, budget)

    cost = pl.CostEstimate(
        flops=2 * M * K * N,
        transcendentals=0,
        bytes_accessed=(M * K_pad * 2 + K_pad * N * 2 + N * 4
                        + M * N * out_itemsize),
    )

    if weight_resident:
        # Weight + bias live untiled in VMEM: one DMA each, single-buffered
        # (equivalent effect to single-buffering the constant-index BlockSpec).
        grid = (pl.cdiv(M, TM),)
        in_specs = [
            pl.BlockSpec((TM, K_pad), lambda i: (i, 0)),              # streamed patches
            pl.BlockSpec(memory_space=pltpu.MemorySpace.VMEM),        # resident weight
            pl.BlockSpec(memory_space=pltpu.MemorySpace.VMEM),        # resident bias
        ]
        out_specs = pl.BlockSpec((TM, N), lambda i: (i, 0))
        out_shape = jax.ShapeDtypeStruct((M, N), out_dtype)
        dims = ("parallel",)
        N_pad = N
    else:
        # Large hidden: stream (K_pad, TN) weight slabs along an inner N axis.
        N_pad = _round_up(N, TN)
        if N_pad != N:
            w_mat = jnp.pad(w_mat, ((0, 0), (0, N_pad - N)))
            b_mat = jnp.pad(b_mat, ((0, 0), (0, N_pad - N)))
        grid = (pl.cdiv(M, TM), N_pad // TN)
        in_specs = [
            pl.BlockSpec((TM, K_pad), lambda i, j: (i, 0)),  # same block across j -> no re-DMA
            pl.BlockSpec((K_pad, TN), lambda i, j: (0, j)),
            pl.BlockSpec((1, TN), lambda i, j: (0, j)),
        ]
        out_specs = pl.BlockSpec((TM, TN), lambda i, j: (i, j))
        out_shape = jax.ShapeDtypeStruct((M, N_pad), out_dtype)
        dims = ("parallel", "arbitrary")

    out = pl.pallas_call(
        _patch_proj_kernel,
        out_shape=out_shape,
        grid_spec=pltpu.PrefetchScalarGridSpec(
            num_scalar_prefetch=0,
            grid=grid,
            in_specs=in_specs,
            out_specs=out_specs,
        ),
        compiler_params=pltpu.CompilerParams(
            dimension_semantics=dims,
            vmem_limit_bytes=vmem_limit,
        ),
        cost_estimate=cost,
    )(patches, w_mat, b_mat)

    if N_pad != N:
        out = out[:, :N]
    return out.reshape(B, num_patches, N)


if __name__ == "__main__":
    # Config consistent with the module: image_size=16, patch_size=4,
    # num_channels=4, hidden_size=32 -> num_patches = (16//4)**2 = 16
    config = dict(image_size=16, patch_size=4, num_channels=4, hidden_size=32)
    B = 2
    C = config["num_channels"]
    S = config["image_size"]
    P = config["patch_size"]
    Hdim = config["hidden_size"]

    key = jax.random.PRNGKey(0)
    kx, kw, kb = jax.random.split(key, 3)
    x = jax.random.normal(kx, (B, C, S, S), dtype=jnp.float32)
    weight = jax.random.normal(kw, (Hdim, C, P, P), dtype=jnp.float32) * 0.02
    bias = jax.random.normal(kb, (Hdim,), dtype=jnp.float32) * 0.02

    prepared = prepare_projection(weight, bias)      # hoisted out of the call path
    out = patch_embeddings(x, weight, bias, P, prepared=prepared,
                           force_pallas=True)        # demo shapes: exercise the kernel
    out = jax.block_until_ready(out)

    # Plain f32 reference (conv-as-matmul).  Kernel uses bf16 MXU operands with
    # f32 accumulation -> loose tolerance.
    nh = S // P
    ref_patches = x.reshape(B, C, nh, P, nh, P).transpose(0, 2, 4, 1, 3, 5)
    ref_patches = ref_patches.reshape(B * nh * nh, C * P * P)
    ref = (ref_patches @ weight.reshape(Hdim, -1).T + bias).reshape(B, nh * nh, Hdim)

    assert out.shape == (B, (S // P) ** 2, Hdim), out.shape
    err = float(jnp.max(jnp.abs(out.astype(jnp.float32) - ref)))
    assert jnp.allclose(out.astype(jnp.float32), ref, atol=1e-2, rtol=1e-2), err
    print("KERNEL_OK")
</pallas_src>

<mosaic_0001>
module attributes {stable_mosaic.version = 11 : i64} {
  func.func @_patch_proj_kernel(%arg0: i32, %arg1: memref<16x128xbf16, #tpu.memory_space<vmem>>, %arg2: memref<128x32xbf16, #tpu.memory_space<vmem>>, %arg3: memref<1x32xf32, #tpu.memory_space<vmem>>, %arg4: memref<16x32xf32, #tpu.memory_space<vmem>>) attributes {dimension_semantics = [#tpu.dimension_semantics<parallel>], iteration_bounds = array<i64: 2>, scalar_prefetch = 0 : i64, scratch_operands = 0 : i64, tpu.core_type = #tpu.core_type<tc>, window_params = [{transform_indices = @transform_0, window_bounds = array<i64: 16, 128>}, {pipeline_mode = #tpu.pipeline_mode<synchronous>, transform_indices = @transform_1, window_bounds = array<i64: 128, 32>}, {pipeline_mode = #tpu.pipeline_mode<synchronous>, transform_indices = @transform_2, window_bounds = array<i64: 1, 32>}, {transform_indices = @transform_3, window_bounds = array<i64: 16, 32>}]} {
    %c0 = arith.constant 0 : index
    %c0_0 = arith.constant 0 : index
    %0 = vector.load %arg1[%c0, %c0_0] : memref<16x128xbf16, #tpu.memory_space<vmem>>, vector<16x128xbf16>
    %c0_1 = arith.constant 0 : index
    %c0_2 = arith.constant 0 : index
    %1 = vector.load %arg2[%c0_1, %c0_2] : memref<128x32xbf16, #tpu.memory_space<vmem>>, vector<128x32xbf16>
    %cst = arith.constant dense<0.000000e+00> : vector<16x32xf32>
    %2 = tpu.matmul %0, %1, %cst {dimension_numbers = #tpu.dot_dimension_numbers<[1], [0], [0], [1], [0, 0, 1, 1], [], []>} : vector<16x128xbf16>, vector<128x32xbf16>, vector<16x32xf32> -> vector<16x32xf32>
    %c0_3 = arith.constant 0 : index
    %c0_4 = arith.constant 0 : index
    %3 = vector.load %arg3[%c0_3, %c0_4] : memref<1x32xf32, #tpu.memory_space<vmem>>, vector<1x32xf32>
    %4 = vector.broadcast %3 : vector<1x32xf32> to vector<16x32xf32>
    %5 = arith.addf %2, %4 : vector<16x32xf32>
    %c0_5 = arith.constant 0 : index
    %c0_6 = arith.constant 0 : index
    %6 = vector.load %arg4[%c0_5, %c0_6] : memref<16x32xf32, #tpu.memory_space<vmem>>, vector<16x32xf32>
    tpu.vector_store %arg4[%c0_5, %c0_6], %5 {strides = array<i32>} : memref<16x32xf32, #tpu.memory_space<vmem>>, vector<16x32xf32>,
    return
  }
  func.func @transform_0(%arg0: i32) -> (i32, i32) {
    %c0_i32 = arith.constant 0 : i32
    %c0_i32_0 = arith.constant 0 : i32
    return %arg0, %c0_i32 : i32, i32
  }
  func.func @transform_1(%arg0: i32) -> (i32, i32) {
    %c0_i32 = arith.constant 0 : i32
    %c0_i32_0 = arith.constant 0 : i32
    %c0_i32_1 = arith.constant 0 : i32
    return %c0_i32, %c0_i32_0 : i32, i32
  }
  func.func @transform_2(%arg0: i32) -> (i32, i32) {
    %c0_i32 = arith.constant 0 : i32
    %c0_i32_0 = arith.constant 0 : i32
    %c0_i32_1 = arith.constant 0 : i32
    return %c0_i32, %c0_i32_0 : i32, i32
  }
  func.func @transform_3(%arg0: i32) -> (i32, i32) {
    %c0_i32 = arith.constant 0 : i32
    %c0_i32_0 = arith.constant 0 : i32
    return %arg0, %c0_i32 : i32, i32
  }
}

</mosaic_0001>

<bundles_post_ra>
// kernel: tpu_custom_call.1
= control target key start
LH: loop header
LB: loop body
LE: loop exit
PB: predicated region body
PF: predicated region fallthrough
CT: control target
= control target key end

     0   :  { %8 = vsyncpa [#allocation3], 0  ;;  %s694_s0 = inlined_call_operand.vmem [shape: bf16[32,128], index: 0, kind: input, shape index: {}]   ;;  %s695_s1 = inlined_call_operand.vmem [shape: bf16[128,32], index: 1, kind: input, shape index: {}]   ;;  %s696_s2 = inlined_call_operand.vmem [shape: f32[1,32], index: 2, kind: input, shape index: {}]   ;;  %s697_s3 = inlined_call_operand.hbm [shape: f32[32,32], index: 3, kind: output, shape index: {}]  }
   0x1   :  { %10 = vsyncpa [#allocation3 + $0x1], 0  ;;  %s565_s12 = smov 0   ;;  %s567_s13 = smov 0  }
   0x2   :  { %s569_s14 = smov 0   ;;  %s571_s15 = smov 0  }
   0x3 LB: > { %s586_s16 = sadd.s32 4294967295, %s538_s15   ;;  %s372_s17 = sadd.s32 4294967294, %s538_s15   ;;  %s538_s15 = sphi %s571_s15, %s703_s15   ;;  %s534_s14 = sphi %s569_s14, %s702_s14   ;;  %s530_s13 = sphi %s567_s13, %s701_s13   ;;  %s526_s12 = sphi %s565_s12, %s700_s12  }
   0x4   : > { %s590_s18 = sadd.s32 1, %s538_s15   ;;  %s91_s19 = sadd.s32 1, %s534_s14 }
   0x5   : > { %s88_s20 = ssub.s32 %s538_s15, %s590_s18  ;;  %p101_p0 = scmp.ne.s32.totalorder %s534_s14, %s530_s13 }
   0x6   : > { %p89_p1 = scmp.eq.s32.totalorder %s88_s20, 0  ;;  %p102_p2 = scmp.eq.s32.totalorder %s586_s16, 1 }
   0x7   : > { %p107_p3 = scmp.ne.s32.totalorder %s530_s13, %s526_s12  ;;  %p108_p4 = scmp.eq.s32.totalorder %s372_s17, 1 }
   0x8   : > { %s601_s21 = scalar_select %p89_p1, %s534_s14, %s91_s19  }
   0x9   : > { %p603_p5 = por %p102_p2, %p101_p0  ;;  %p607_p6 = por %p108_p4, %p107_p3 }
   0xa   : > { %p375_p7 = scmp.ge.s32.totalorder %s538_s15, 1  ;;  %p141_p8 = scmp.lt.s32.totalorder %s538_s15, 3 }
   0xc   : > { %p142_p9 = pnand %p375_p7, %p141_p8 }
   0xd   : > { %v467_v0 = vld [vmem:[%s695_s1] sm:$0xff] (!%p142_p9)   ;;  %v540_v1 = vmov (!%p142_p9), 0.0   ;;  %v468_v2 = vld [vmem:[%s695_s1 + $0x8] sm:$0xff] (!%p142_p9)   ;;  %vm541_vm0 = vmmov (!%p142_p9), 0   ;;  %s377_s28 = sshll.u32 (!%p142_p9), %s586_s16, 1  ;;  %v469_v3 = vld [vmem:[%s695_s1 + $0x10] sm:$0xff] (!%p142_p9)  }
   0xe   : > { %145 = sbr.rel (%p142_p9) target bundleno = 277 (0x115), region = 32  ;;  %404 = vmatprep.subr.bf16.mxu0 (!%p142_p9), %v540_v1  ;;  %420 = vmatprep.mubr.msk.bf16.mxu0 (!%p142_p9), %vm541_vm0, %v540_v1  ;;  %p166_p10 = scmp.lt.s32.totalorder (!%p142_p9), %s377_s28, 3  ;;  %v470_v4 = vld [vmem:[%s695_s1 + $0x18] sm:$0xff] (!%p142_p9)   ;;  %v471_v5 = vld [vmem:[%s695_s1 + $0x20] sm:$0xff] (!%p142_p9)   ;;  %v472_v6 = vld [vmem:[%s695_s1 + $0x28] sm:$0xff] (!%p142_p9)   ;;  %vm293_vm1 = vcmask (!%p142_p9), 261120  }
   0xf   : > { %405 = vmatpush3.bf16.msra.mxu0 (!%p142_p9), %v467_v0  ;;  %v473_v7 = vld [vmem:[%s695_s1 + $0x30] sm:$0xff] (!%p142_p9)   ;;  %v474_v8 = vld [vmem:[%s695_s1 + $0x38] sm:$0xff] (!%p142_p9)   ;;  %s162_s27 = sand.u32 (!%p142_p9), 1, %s530_s13   ;;  %v379_v10 = vld [vmem:[%s696_s2] ss:$0 sm:$0xff] (!%p142_p9)  ;;  %s394_s6 = sshll.u32 (!%p142_p9), %s586_s16, 8 }
  0x10   : > { %406 = vmatprep.subr.bf16.mxu0 (!%p142_p9), %v540_v1  ;;  %s651_s9 = scalar_lea.hbm (!%p142_p9), %s697_s3, %s394_s6  ;;  %s653_s16 = scalar_lea.sflag (!%p142_p9), [#allocation3], %s162_s27 }
  0x11   : > { %s542_s11 = smov (!%p142_p9), [#allocation2]  }
  0x12   : > { %s480_s17 = sshll.u32 (!%p142_p9), %s542_s11, 4  ;;  %s481_s17 = int_to_ptr.vmem [resolvable:$false] %s480_s17 }
  0x13   : > { %407 = vmatpush3.bf16.msra.mxu0 (!%p142_p9), %v468_v2  ;;  %s482_s19 = scalar_lea.vmem (!%p142_p9), %s481_s17, 512 }
  0x14   : > { %408 = vmatprep.subr.bf16.mxu0 (!%p142_p9), %v540_v1 }
  0x15   : > { %s705_s28 = smov (!%p166_p10, %s377_s28), 3 }
  0x16   : > { %s378_s4 = sshll.u32 %s705_s28, 2  ;;  %s376_s28 = sshll.u32 %s162_s27, 4 }
  0x17   : > { %s169_s7 = scalar_lea.vmem %s694_s0, %s378_s4  ;;  %409 = vmatpush3.bf16.msra.mxu0 %v469_v3  ;;  %s164_s4 = scalar_lea.vmem [#allocation2], %s376_s28 }
  0x18   : > { %410 = vmatprep.subr.bf16.mxu0 %v540_v1  ;;  %v475_v9 = vld [vmem:[%s169_s7] sm:$0xff]   ;;  %s310_s5 = sshll.u32 %s164_s4, 4  ;;  %s646_s5 = int_to_ptr.vmem [resolvable:$true] %s310_s5 }
  0x19   : > { %s476_s10 = scalar_lea.vmem %s646_s5, 256  ;;  %p483_p0 = scmp.lt.s32.totalorder %s646_s5, %s481_s17 }
  0x1a   : > { %p477_p11 = scmp.ne.s32.totalorder %s646_s5, %s476_s10  ;;  %p484_p1 = scmp.lt.s32.totalorder %s482_s19, %s476_s10 }
  0x1b   : > { %411 = vmatpush3.bf16.msra.mxu0 %v470_v4 }
  0x1c   : > { %412 = vmatprep.subr.bf16.mxu0 %v540_v1  ;;  %p478_p12 = pnand %p477_p11, %p603_p5  ;;  %p485_p2 = por %p484_p1, %p483_p0 }
  0x1e   : > { %p479_p13 = pneg %p478_p12 }
  0x1f   : > { %413 = vmatpush3.bf16.msra.mxu0 %v471_v5 }
  0x20   : > { %414 = vmatprep.subr.bf16.mxu0 %v540_v1  ;;  %p486_p3 = pnand %p485_p2, %p479_p13 }
  0x23   : > { %415 = vmatpush3.bf16.msra.mxu0 %v472_v6 }
  0x24   : > { %416 = vmatprep.subr.bf16.mxu0 %v540_v1 }
  0x27   : > { %417 = vmatpush3.bf16.msra.mxu0 %v473_v7 }
  0x28   : > { %418 = vmatprep.subr.bf16.mxu0 %v540_v1 }
  0x2b   : > { %419 = vmatpush3.bf16.msra.mxu0 %v474_v8 }
  0x2e   : > { %421 = vmatmul.mubr.bf16.vlgmr.msra.gmra.mrb[0].mxu0 %v475_v9 }
 0x101   : > { %v286_v11 = vpop.f32.mrb[0].mxu0 }
 0x102   : > { %v287_v12 = vadd.f32 %v379_v10, %v286_v11  ;;  %v422_v13 = vpop.f32.mrb[1].mxu0 }
 0x103   : > { %v289_v14 = vpop.f32.mrb[2].mxu0 }
 0x104   : > { %294 = vst.msk [vmem:[%s164_s4] sm:$0xff] %vm293_vm1, %v287_v12  ;;  %v290_v15 = vadd.f32 %v379_v10, %v289_v14  ;;  %v423_v16 = vpop.f32.mrb[3].mxu0 }
 0x106   : > { %295 = vst.msk [vmem:[%s164_s4 + $0x8] sm:$0xff] %vm293_vm1, %v290_v15 }
 0x107   : > { %489 = shalt.err (!%p486_p3)
}
 0x108   : > { %s490_s20 = scalar_lea.hbm %s651_s9, 256  ;;  %s494_s26 = scalar_lea.hbm %s697_s3, 512 }
 0x109   : > { %p491_p4 = scmp.ne.s32.totalorder %s651_s9, %s490_s20  ;;  %p495_p9 = scmp.lt.u32.totalorder %s651_s9, %s697_s3 }
 0x10a   : > { %p496_p10 = scmp.lt.u32.totalorder %s494_s26, %s490_s20  ;;  %p498_p12 = scmp.lt.u32.totalorder %s490_s20, %s651_s9 }
 0x10b   : > { %p492_p7 = pnand %p491_p4, %p603_p5 }
 0x10c   : > { %p497_p11 = por %p496_p10, %p495_p9 }
 0x10d   : > { %p493_p8 = pneg %p492_p7 }
 0x10e   : > { %p499_p13 = por %p498_p12, %p497_p11 }
 0x110   : > { %p500_p0 = pnand %p499_p13, %p493_p8 }
 0x112   : > { %503 = shalt.err (!%p500_p0)
}
 0x113   : > { %s543_s29 = smov 128   ;;  %s544_s30 = smov 8  }
 0x114   : > { %424 = dma.vmem_to_hbm [thread:$0]  (%p603_p5), %s646_s5, 256, %s651_s9, %s653_s16, %s543_s29, %s543_s29, %s544_s30  }
 0x115 PF: > { %p430_p1 = scmp.ge.s32.totalorder %s538_s15, 2  ;;  %s325_s4 = sand.u32 1, %s526_s12  }
 0x116   : > { %s326_s6 = scalar_lea.sflag [#allocation3], %s325_s4 }
 0x117   : > { %p427_p2 = pnand %p430_p1, %p607_p6 }
 0x119   : > { %521 = dma.done.wait (!%p427_p2), %s326_s6, 256  }
 0x11a   : > { %523 = vsyncadd (!%p427_p2), %s326_s6, 4294967040  ;;  %p13_p3 = scmp.ge.s32.totalorder %s590_s18, 4   ;;  %s700_s12 = smov %s530_s13 }
 0x11b   : > { %s701_s13 = smov %s534_s14  ;;  %s702_s14 = smov %s601_s21 }
 0x11c   : > { %s703_s15 = smov %s590_s18  ;;  %15 = sbr.rel (!%p13_p3) target bundleno = 3 (0x3), region = 67 }
 0x123   :  { %331 = vsyncpa [#allocation3], 1 }
 0x124   :  { %333 = vsyncpa [#allocation3 + $0x1], 1 }

</bundles_post_ra>
